<compile_context>
chip_gen: v6e
topology: v6e:2x2x1
jax: 0.10.0
libtpu: 0.0.40
codegen_flags: <defaults>
</compile_context>

<pallas_src>
import functools

import jax
import jax.numpy as jnp
from jax.experimental import pallas as pl
from jax.experimental.pallas import tpu as pltpu


LN_EPS = 1e-5


def _layernorm(x, gamma, beta):
    # x: (T, C) f32; gamma/beta: (1, C) f32. PyTorch LayerNorm: biased variance, eps=1e-5.
    mean = jnp.mean(x, axis=-1, keepdims=True)
    xc = x - mean
    var = jnp.mean(xc * xc, axis=-1, keepdims=True)
    inv = jax.lax.rsqrt(var + LN_EPS)
    return xc * inv * gamma + beta


# NT matmul dimension numbers: contract last dim of both operands (q @ k^T without k^T).
_NT_DIMS = (((1,), (1,)), ((), ()))


def rab_kernel(
    x_q_ref, x_kv_ref,
    ln1_g_ref, ln1_b_ref,
    wq_T_ref, bq_ref,
    wkv_T_ref, bkv_ref,
    proj_wT_ref, proj_b_ref,
    ln2_g_ref, ln2_b_ref,
    fc1_wT_ref, fc1_b_ref,
    fc2_wT_ref, fc2_b_ref,
    o_ref,
    *, num_heads,
):
    x_q = x_q_ref[0].astype(jnp.float32)     # (TQ, C) query-token tile
    x_kv = x_kv_ref[0].astype(jnp.float32)   # (N,  C) full token slab (K/V source)
    tq, C = x_q.shape
    hd = C // num_heads

    ln1_g = ln1_g_ref[...]
    ln1_b = ln1_b_ref[...]

    # ---- attention branch: x + out_proj(MHA(ln_1(x))) ------------------------------
    h_q = _layernorm(x_q, ln1_g, ln1_b)
    # softmax scale (head_dim^-0.5) is pre-folded into wq_T / bq at init time.
    q = jnp.dot(h_q.astype(jnp.bfloat16), wq_T_ref[...],
                preferred_element_type=jnp.float32) + bq_ref[...]            # (TQ, C)

    # K/V recomputed per query tile from the full slab (cheap for moderate N; an
    # alternative is staging k/v in VMEM scratch once per batch).
    h_kv = _layernorm(x_kv, ln1_g, ln1_b)
    kv = jnp.dot(h_kv.astype(jnp.bfloat16), wkv_T_ref[...],
                 preferred_element_type=jnp.float32) + bkv_ref[...]          # (N, 2C)
    k = kv[:, :C].astype(jnp.bfloat16)
    v = kv[:, C:].astype(jnp.bfloat16)
    qb = q.astype(jnp.bfloat16)

    head_outs = []
    for h in range(num_heads):
        lo = h * hd
        qh = qb[:, lo:lo + hd]                                               # (TQ, hd)
        kh = k[:, lo:lo + hd]                                                # (N,  hd)
        vh = v[:, lo:lo + hd]                                                # (N,  hd)
        # scores = q @ k^T via NT matmul (no XLU transpose), f32 accumulation.
        s = jax.lax.dot_general(qh, kh, _NT_DIMS,
                                preferred_element_type=jnp.float32)          # (TQ, N)
        s = s - jnp.max(s, axis=-1, keepdims=True)
        e = jnp.exp(s)
        denom = jnp.sum(e, axis=-1, keepdims=True)
        p = e * pl.reciprocal(denom, approx=True)                            # softmax
        head_outs.append(jnp.dot(p.astype(jnp.bfloat16), vh,
                                 preferred_element_type=jnp.float32))        # (TQ, hd)
    attn = jnp.concatenate(head_outs, axis=-1)                               # (TQ, C)

    attn = jnp.dot(attn.astype(jnp.bfloat16), proj_wT_ref[...],
                   preferred_element_type=jnp.float32) + proj_b_ref[...]     # out_proj
    x1 = x_q + attn

    # ---- MLP branch: x + c_proj(QuickGELU(c_fc(ln_2(x)))) ---------------------------
    h2 = _layernorm(x1, ln2_g_ref[...], ln2_b_ref[...])
    z = jnp.dot(h2.astype(jnp.bfloat16), fc1_wT_ref[...],
                preferred_element_type=jnp.float32) + fc1_b_ref[...]         # (TQ, H)
    # QuickGELU: z * sigmoid(1.702 * z); reciprocal runs on the EUP slot.
    z = z * pl.reciprocal(1.0 + jnp.exp(-1.702 * z), approx=True)
    z = jnp.dot(z.astype(jnp.bfloat16), fc2_wT_ref[...],
                preferred_element_type=jnp.float32) + fc2_b_ref[...]         # (TQ, C)

    o_ref[0] = (x1 + z).astype(o_ref.dtype)


def _pick_tq(n, cap=128):
    """Largest query-tile size <= cap that evenly divides n (multiple of 8 if tiled)."""
    if n <= cap:
        return n
    tq = cap - (cap % 8)
    while tq >= 8:
        if n % tq == 0:
            return tq
        tq -= 8
    return n


def _vmem_limit_bytes(N, C, H, tq):
    f32, bf16 = 4, 2
    blocks = (
        tq * C * f32 * 2          # x query tile + output tile
        + N * C * f32             # full x slab
        + 4 * C * f32             # ln1/ln2 gamma+beta
        + (C * C + C * 2 * C + C * C + C * H + H * C) * bf16   # weights
        + (C + 2 * C + C + H + C) * f32                        # biases
    )
    work = (
        N * 3 * C * f32           # h_kv + kv
        + tq * C * f32 * 4        # h_q, q, attn, residual temps
        + tq * N * f32 * 2        # per-head scores + exp
        + tq * H * f32 * 2        # MLP hidden + QuickGELU temp
    )
    est = 2 * blocks + work       # streamed blocks are double-buffered by the pipeline
    return int(min(max(4 * est, 32 * 1024 * 1024), 100 * 1024 * 1024))


def residual_attention_block(x, params, num_heads, *, tq=None):
    # TODO(synk): key_padding_mask / attn_mask are not supported (None path only).
    B, N, C = x.shape
    H = params["fc1_wT"].shape[1]
    assert C % num_heads == 0
    if tq is None:
        tq = _pick_tq(N)
    assert N % tq == 0
    nqt = N // tq

    const = lambda shape: pl.BlockSpec(shape, lambda b, qi: (0, 0))

    kernel = functools.partial(rab_kernel, num_heads=num_heads)

    return pl.pallas_call(
        kernel,
        out_shape=jax.ShapeDtypeStruct((B, N, C), x.dtype),
        grid_spec=pltpu.PrefetchScalarGridSpec(
            num_scalar_prefetch=0,
            grid=(B, nqt),
            in_specs=[
                pl.BlockSpec((1, tq, C), lambda b, qi: (b, qi, 0)),   # x (query tile)
                pl.BlockSpec((1, N, C), lambda b, qi: (b, 0, 0)),     # x (full slab for K/V)
                const((1, C)), const((1, C)),                         # ln_1 gamma, beta
                const((C, C)), const((1, C)),                         # Wq^T (scaled), bq (scaled)
                const((C, 2 * C)), const((1, 2 * C)),                 # Wkv^T, bkv
                const((C, C)), const((1, C)),                         # out_proj W^T, b
                const((1, C)), const((1, C)),                         # ln_2 gamma, beta
                const((C, H)), const((1, H)),                         # c_fc W^T, b
                const((H, C)), const((1, C)),                         # c_proj W^T, b
            ],
            out_specs=pl.BlockSpec((1, tq, C), lambda b, qi: (b, qi, 0)),
        ),
        compiler_params=pltpu.CompilerParams(
            dimension_semantics=("parallel", "parallel"),
            vmem_limit_bytes=_vmem_limit_bytes(N, C, H, tq),
        ),
    )(
        x, x,
        params["ln1_g"], params["ln1_b"],
        params["wq_T"], params["bq"],
        params["wkv_T"], params["bkv"],
        params["proj_wT"], params["proj_b"],
        params["ln2_g"], params["ln2_b"],
        params["fc1_wT"], params["fc1_b"],
        params["fc2_wT"], params["fc2_b"],
    )


def init_params(key, dim, num_heads, mlp_ratio=4.0, weight_dtype=jnp.bfloat16):
    hidden = int(dim * mlp_ratio)
    hd = dim // num_heads
    scale = hd ** (-0.5)
    ks = jax.random.split(key, 8)
    std = 0.02

    # PyTorch layouts: in_proj_weight (3C, C) rows ordered [Q; K; V]; Linear weight (out, in).
    in_proj_w = jax.random.normal(ks[0], (3 * dim, dim), jnp.float32) * std
    in_proj_b = jax.random.normal(ks[1], (3 * dim,), jnp.float32) * std
    proj_w = jax.random.normal(ks[2], (dim, dim), jnp.float32) * std
    proj_b = jax.random.normal(ks[3], (dim,), jnp.float32) * std
    fc1_w = jax.random.normal(ks[4], (hidden, dim), jnp.float32) * std
    fc1_b = jax.random.normal(ks[5], (hidden,), jnp.float32) * std
    fc2_w = jax.random.normal(ks[6], (dim, hidden), jnp.float32) * std
    fc2_b = jax.random.normal(ks[7], (dim,), jnp.float32) * std

    wq, wkv = in_proj_w[:dim], in_proj_w[dim:]
    bq, bkv = in_proj_b[:dim], in_proj_b[dim:]

    return {
        "ln1_g": jnp.ones((1, dim), jnp.float32),
        "ln1_b": jnp.zeros((1, dim), jnp.float32),
        # softmax scale folded into the Q projection (zero runtime cost).
        "wq_T": (wq.T * scale).astype(weight_dtype),          # (C, C)
        "bq": (bq * scale).reshape(1, dim).astype(jnp.float32),
        "wkv_T": wkv.T.astype(weight_dtype),                  # (C, 2C)
        "bkv": bkv.reshape(1, 2 * dim).astype(jnp.float32),
        "proj_wT": proj_w.T.astype(weight_dtype),             # (C, C)
        "proj_b": proj_b.reshape(1, dim).astype(jnp.float32),
        "ln2_g": jnp.ones((1, dim), jnp.float32),
        "ln2_b": jnp.zeros((1, dim), jnp.float32),
        "fc1_wT": fc1_w.T.astype(weight_dtype),               # (C, 4C)
        "fc1_b": fc1_b.reshape(1, hidden).astype(jnp.float32),
        "fc2_wT": fc2_w.T.astype(weight_dtype),               # (4C, C)
        "fc2_b": fc2_b.reshape(1, dim).astype(jnp.float32),
    }


if __name__ == "__main__":
    B, N, C = 2, 8, 32
    num_heads = 4

    key = jax.random.PRNGKey(0)
    kx, kp = jax.random.split(key)
    x = jax.random.normal(kx, (B, N, C), jnp.float32)
    params = init_params(kp, C, num_heads, mlp_ratio=4.0)

    out = residual_attention_block(x, params, num_heads)
    out = jax.block_until_ready(out)
    assert out.shape == (B, N, C)
    assert bool(jnp.all(jnp.isfinite(out)))
    print("KERNEL_OK")
</pallas_src>

<mosaic_0001>
module attributes {stable_mosaic.version = 11 : i64} {
  func.func @rab_kernel(%arg0: i32, %arg1: i32, %arg2: memref<1x8x32xf32, #tpu.memory_space<vmem>>, %arg3: memref<1x8x32xf32, #tpu.memory_space<vmem>>, %arg4: memref<1x32xf32, #tpu.memory_space<vmem>>, %arg5: memref<1x32xf32, #tpu.memory_space<vmem>>, %arg6: memref<32x32xbf16, #tpu.memory_space<vmem>>, %arg7: memref<1x32xf32, #tpu.memory_space<vmem>>, %arg8: memref<32x64xbf16, #tpu.memory_space<vmem>>, %arg9: memref<1x64xf32, #tpu.memory_space<vmem>>, %arg10: memref<32x32xbf16, #tpu.memory_space<vmem>>, %arg11: memref<1x32xf32, #tpu.memory_space<vmem>>, %arg12: memref<1x32xf32, #tpu.memory_space<vmem>>, %arg13: memref<1x32xf32, #tpu.memory_space<vmem>>, %arg14: memref<32x128xbf16, #tpu.memory_space<vmem>>, %arg15: memref<1x128xf32, #tpu.memory_space<vmem>>, %arg16: memref<128x32xbf16, #tpu.memory_space<vmem>>, %arg17: memref<1x32xf32, #tpu.memory_space<vmem>>, %arg18: memref<1x8x32xf32, #tpu.memory_space<vmem>>) attributes {dimension_semantics = [#tpu.dimension_semantics<parallel>, #tpu.dimension_semantics<parallel>], iteration_bounds = array<i64: 2, 1>, scalar_prefetch = 0 : i64, scratch_operands = 0 : i64, tpu.core_type = #tpu.core_type<tc>, window_params = [{transform_indices = @transform_0, window_bounds = array<i64: 1, 8, 32>}, {transform_indices = @transform_1, window_bounds = array<i64: 1, 8, 32>}, {pipeline_mode = #tpu.pipeline_mode<synchronous>, transform_indices = @transform_2, window_bounds = array<i64: 1, 32>}, {pipeline_mode = #tpu.pipeline_mode<synchronous>, transform_indices = @transform_3, window_bounds = array<i64: 1, 32>}, {pipeline_mode = #tpu.pipeline_mode<synchronous>, transform_indices = @transform_4, window_bounds = array<i64: 32, 32>}, {pipeline_mode = #tpu.pipeline_mode<synchronous>, transform_indices = @transform_5, window_bounds = array<i64: 1, 32>}, {pipeline_mode = #tpu.pipeline_mode<synchronous>, transform_indices = @transform_6, window_bounds = array<i64: 32, 64>}, {pipeline_mode = #tpu.pipeline_mode<synchronous>, transform_indices = @transform_7, window_bounds = array<i64: 1, 64>}, {pipeline_mode = #tpu.pipeline_mode<synchronous>, transform_indices = @transform_8, window_bounds = array<i64: 32, 32>}, {pipeline_mode = #tpu.pipeline_mode<synchronous>, transform_indices = @transform_9, window_bounds = array<i64: 1, 32>}, {pipeline_mode = #tpu.pipeline_mode<synchronous>, transform_indices = @transform_10, window_bounds = array<i64: 1, 32>}, {pipeline_mode = #tpu.pipeline_mode<synchronous>, transform_indices = @transform_11, window_bounds = array<i64: 1, 32>}, {pipeline_mode = #tpu.pipeline_mode<synchronous>, transform_indices = @transform_12, window_bounds = array<i64: 32, 128>}, {pipeline_mode = #tpu.pipeline_mode<synchronous>, transform_indices = @transform_13, window_bounds = array<i64: 1, 128>}, {pipeline_mode = #tpu.pipeline_mode<synchronous>, transform_indices = @transform_14, window_bounds = array<i64: 128, 32>}, {pipeline_mode = #tpu.pipeline_mode<synchronous>, transform_indices = @transform_15, window_bounds = array<i64: 1, 32>}, {transform_indices = @transform_16, window_bounds = array<i64: 1, 8, 32>}]} {
    %c0 = arith.constant 0 : index
    %c0_0 = arith.constant 0 : index
    %c0_1 = arith.constant 0 : index
    %0 = vector.load %arg2[%c0, %c0_0, %c0_1] : memref<1x8x32xf32, #tpu.memory_space<vmem>>, vector<1x8x32xf32>
    %1 = vector.shape_cast %0 : vector<1x8x32xf32> to vector<8x32xf32>
    %c0_2 = arith.constant 0 : index
    %c0_3 = arith.constant 0 : index
    %c0_4 = arith.constant 0 : index
    %2 = vector.load %arg3[%c0_2, %c0_3, %c0_4] : memref<1x8x32xf32, #tpu.memory_space<vmem>>, vector<1x8x32xf32>
    %3 = vector.shape_cast %2 : vector<1x8x32xf32> to vector<8x32xf32>
    %c0_5 = arith.constant 0 : index
    %c0_6 = arith.constant 0 : index
    %4 = vector.load %arg4[%c0_5, %c0_6] : memref<1x32xf32, #tpu.memory_space<vmem>>, vector<1x32xf32>
    %c0_7 = arith.constant 0 : index
    %c0_8 = arith.constant 0 : index
    %5 = vector.load %arg5[%c0_7, %c0_8] : memref<1x32xf32, #tpu.memory_space<vmem>>, vector<1x32xf32>
    %cst = arith.constant dense<0.000000e+00> : vector<8xf32>
    %6 = vector.multi_reduction <add>, %1, %cst [1] : vector<8x32xf32> to vector<8xf32>
    %7 = vector.shape_cast %6 : vector<8xf32> to vector<8x1xf32>
    %cst_9 = arith.constant 3.200000e+01 : f32
    %8 = vector.broadcast %cst_9 : f32 to vector<8x1xf32>
    %9 = arith.divf %7, %8 : vector<8x1xf32>
    %10 = vector.broadcast %9 : vector<8x1xf32> to vector<8x32xf32>
    %11 = arith.subf %1, %10 : vector<8x32xf32>
    %12 = arith.mulf %11, %11 : vector<8x32xf32>
    %cst_10 = arith.constant dense<0.000000e+00> : vector<8xf32>
    %13 = vector.multi_reduction <add>, %12, %cst_10 [1] : vector<8x32xf32> to vector<8xf32>
    %14 = vector.shape_cast %13 : vector<8xf32> to vector<8x1xf32>
    %cst_11 = arith.constant 3.200000e+01 : f32
    %15 = vector.broadcast %cst_11 : f32 to vector<8x1xf32>
    %16 = arith.divf %14, %15 : vector<8x1xf32>
    %cst_12 = arith.constant 9.99999974E-6 : f32
    %17 = vector.broadcast %cst_12 : f32 to vector<8x1xf32>
    %18 = arith.addf %16, %17 : vector<8x1xf32>
    %19 = math.rsqrt %18 : vector<8x1xf32>
    %20 = vector.broadcast %19 : vector<8x1xf32> to vector<8x32xf32>
    %21 = arith.mulf %11, %20 : vector<8x32xf32>
    %22 = vector.broadcast %4 : vector<1x32xf32> to vector<8x32xf32>
    %23 = arith.mulf %21, %22 : vector<8x32xf32>
    %24 = vector.broadcast %5 : vector<1x32xf32> to vector<8x32xf32>
    %25 = arith.addf %23, %24 : vector<8x32xf32>
    %26 = arith.truncf %25 : vector<8x32xf32> to vector<8x32xbf16>
    %c0_13 = arith.constant 0 : index
    %c0_14 = arith.constant 0 : index
    %27 = vector.load %arg6[%c0_13, %c0_14] : memref<32x32xbf16, #tpu.memory_space<vmem>>, vector<32x32xbf16>
    %cst_15 = arith.constant dense<0.000000e+00> : vector<8x32xf32>
    %28 = tpu.matmul %26, %27, %cst_15 {dimension_numbers = #tpu.dot_dimension_numbers<[1], [0], [0], [1], [0, 0, 1, 1], [], []>} : vector<8x32xbf16>, vector<32x32xbf16>, vector<8x32xf32> -> vector<8x32xf32>
    %c0_16 = arith.constant 0 : index
    %c0_17 = arith.constant 0 : index
    %29 = vector.load %arg7[%c0_16, %c0_17] : memref<1x32xf32, #tpu.memory_space<vmem>>, vector<1x32xf32>
    %30 = vector.broadcast %29 : vector<1x32xf32> to vector<8x32xf32>
    %31 = arith.addf %28, %30 : vector<8x32xf32>
    %cst_18 = arith.constant dense<0.000000e+00> : vector<8xf32>
    %32 = vector.multi_reduction <add>, %3, %cst_18 [1] : vector<8x32xf32> to vector<8xf32>
    %33 = vector.shape_cast %32 : vector<8xf32> to vector<8x1xf32>
    %cst_19 = arith.constant 3.200000e+01 : f32
    %34 = vector.broadcast %cst_19 : f32 to vector<8x1xf32>
    %35 = arith.divf %33, %34 : vector<8x1xf32>
    %36 = vector.broadcast %35 : vector<8x1xf32> to vector<8x32xf32>
    %37 = arith.subf %3, %36 : vector<8x32xf32>
    %38 = arith.mulf %37, %37 : vector<8x32xf32>
    %cst_20 = arith.constant dense<0.000000e+00> : vector<8xf32>
    %39 = vector.multi_reduction <add>, %38, %cst_20 [1] : vector<8x32xf32> to vector<8xf32>
    %40 = vector.shape_cast %39 : vector<8xf32> to vector<8x1xf32>
    %cst_21 = arith.constant 3.200000e+01 : f32
    %41 = vector.broadcast %cst_21 : f32 to vector<8x1xf32>
    %42 = arith.divf %40, %41 : vector<8x1xf32>
    %cst_22 = arith.constant 9.99999974E-6 : f32
    %43 = vector.broadcast %cst_22 : f32 to vector<8x1xf32>
    %44 = arith.addf %42, %43 : vector<8x1xf32>
    %45 = math.rsqrt %44 : vector<8x1xf32>
    %46 = vector.broadcast %45 : vector<8x1xf32> to vector<8x32xf32>
    %47 = arith.mulf %37, %46 : vector<8x32xf32>
    %48 = vector.broadcast %4 : vector<1x32xf32> to vector<8x32xf32>
    %49 = arith.mulf %47, %48 : vector<8x32xf32>
    %50 = vector.broadcast %5 : vector<1x32xf32> to vector<8x32xf32>
    %51 = arith.addf %49, %50 : vector<8x32xf32>
    %52 = arith.truncf %51 : vector<8x32xf32> to vector<8x32xbf16>
    %c0_23 = arith.constant 0 : index
    %c0_24 = arith.constant 0 : index
    %53 = vector.load %arg8[%c0_23, %c0_24] : memref<32x64xbf16, #tpu.memory_space<vmem>>, vector<32x64xbf16>
    %cst_25 = arith.constant dense<0.000000e+00> : vector<8x64xf32>
    %54 = tpu.matmul %52, %53, %cst_25 {dimension_numbers = #tpu.dot_dimension_numbers<[1], [0], [0], [1], [0, 0, 1, 1], [], []>} : vector<8x32xbf16>, vector<32x64xbf16>, vector<8x64xf32> -> vector<8x64xf32>
    %c0_26 = arith.constant 0 : index
    %c0_27 = arith.constant 0 : index
    %55 = vector.load %arg9[%c0_26, %c0_27] : memref<1x64xf32, #tpu.memory_space<vmem>>, vector<1x64xf32>
    %56 = vector.broadcast %55 : vector<1x64xf32> to vector<8x64xf32>
    %57 = arith.addf %54, %56 : vector<8x64xf32>
    %58 = vector.extract_strided_slice %57 {offsets = [0, 0], sizes = [8, 32], strides = [1, 1]} : vector<8x64xf32> to vector<8x32xf32>
    %59 = arith.truncf %58 : vector<8x32xf32> to vector<8x32xbf16>
    %60 = vector.extract_strided_slice %57 {offsets = [0, 32], sizes = [8, 32], strides = [1, 1]} : vector<8x64xf32> to vector<8x32xf32>
    %61 = arith.truncf %60 : vector<8x32xf32> to vector<8x32xbf16>
    %62 = arith.truncf %31 : vector<8x32xf32> to vector<8x32xbf16>
    %63 = vector.extract_strided_slice %62 {offsets = [0, 0], sizes = [8, 8], strides = [1, 1]} : vector<8x32xbf16> to vector<8x8xbf16>
    %64 = vector.extract_strided_slice %59 {offsets = [0, 0], sizes = [8, 8], strides = [1, 1]} : vector<8x32xbf16> to vector<8x8xbf16>
    %65 = vector.extract_strided_slice %61 {offsets = [0, 0], sizes = [8, 8], strides = [1, 1]} : vector<8x32xbf16> to vector<8x8xbf16>
    %cst_28 = arith.constant dense<0.000000e+00> : vector<8x8xf32>
    %66 = tpu.matmul %63, %64, %cst_28 {dimension_numbers = #tpu.dot_dimension_numbers<[1], [1], [0], [0], [0, 0, 1, 0], [], []>} : vector<8x8xbf16>, vector<8x8xbf16>, vector<8x8xf32> -> vector<8x8xf32>
    %cst_29 = arith.constant dense<0xFF800000> : vector<8xf32>
    %67 = vector.multi_reduction <maximumf>, %66, %cst_29 [1] : vector<8x8xf32> to vector<8xf32>
    %68 = vector.shape_cast %67 : vector<8xf32> to vector<8x1xf32>
    %69 = vector.broadcast %68 : vector<8x1xf32> to vector<8x8xf32>
    %70 = arith.subf %66, %69 : vector<8x8xf32>
    %71 = math.exp %70 : vector<8x8xf32>
    %cst_30 = arith.constant dense<0.000000e+00> : vector<8xf32>
    %72 = vector.multi_reduction <add>, %71, %cst_30 [1] : vector<8x8xf32> to vector<8xf32>
    %73 = vector.shape_cast %72 : vector<8xf32> to vector<8x1xf32>
    %74 = tpu.reciprocal %73 {approx = true} : vector<8x1xf32> -> vector<8x1xf32>
    %75 = vector.broadcast %74 : vector<8x1xf32> to vector<8x8xf32>
    %76 = arith.mulf %71, %75 : vector<8x8xf32>
    %77 = arith.truncf %76 : vector<8x8xf32> to vector<8x8xbf16>
    %cst_31 = arith.constant dense<0.000000e+00> : vector<8x8xf32>
    %78 = tpu.matmul %77, %65, %cst_31 {dimension_numbers = #tpu.dot_dimension_numbers<[1], [0], [0], [1], [0, 0, 1, 1], [], []>} : vector<8x8xbf16>, vector<8x8xbf16>, vector<8x8xf32> -> vector<8x8xf32>
    %79 = vector.extract_strided_slice %62 {offsets = [0, 8], sizes = [8, 8], strides = [1, 1]} : vector<8x32xbf16> to vector<8x8xbf16>
    %80 = vector.extract_strided_slice %59 {offsets = [0, 8], sizes = [8, 8], strides = [1, 1]} : vector<8x32xbf16> to vector<8x8xbf16>
    %81 = vector.extract_strided_slice %61 {offsets = [0, 8], sizes = [8, 8], strides = [1, 1]} : vector<8x32xbf16> to vector<8x8xbf16>
    %cst_32 = arith.constant dense<0.000000e+00> : vector<8x8xf32>
    %82 = tpu.matmul %79, %80, %cst_32 {dimension_numbers = #tpu.dot_dimension_numbers<[1], [1], [0], [0], [0, 0, 1, 0], [], []>} : vector<8x8xbf16>, vector<8x8xbf16>, vector<8x8xf32> -> vector<8x8xf32>
    %cst_33 = arith.constant dense<0xFF800000> : vector<8xf32>
    %83 = vector.multi_reduction <maximumf>, %82, %cst_33 [1] : vector<8x8xf32> to vector<8xf32>
    %84 = vector.shape_cast %83 : vector<8xf32> to vector<8x1xf32>
    %85 = vector.broadcast %84 : vector<8x1xf32> to vector<8x8xf32>
    %86 = arith.subf %82, %85 : vector<8x8xf32>
    %87 = math.exp %86 : vector<8x8xf32>
    %cst_34 = arith.constant dense<0.000000e+00> : vector<8xf32>
    %88 = vector.multi_reduction <add>, %87, %cst_34 [1] : vector<8x8xf32> to vector<8xf32>
    %89 = vector.shape_cast %88 : vector<8xf32> to vector<8x1xf32>
    %90 = tpu.reciprocal %89 {approx = true} : vector<8x1xf32> -> vector<8x1xf32>
    %91 = vector.broadcast %90 : vector<8x1xf32> to vector<8x8xf32>
    %92 = arith.mulf %87, %91 : vector<8x8xf32>
    %93 = arith.truncf %92 : vector<8x8xf32> to vector<8x8xbf16>
    %cst_35 = arith.constant dense<0.000000e+00> : vector<8x8xf32>
    %94 = tpu.matmul %93, %81, %cst_35 {dimension_numbers = #tpu.dot_dimension_numbers<[1], [0], [0], [1], [0, 0, 1, 1], [], []>} : vector<8x8xbf16>, vector<8x8xbf16>, vector<8x8xf32> -> vector<8x8xf32>
    %95 = vector.extract_strided_slice %62 {offsets = [0, 16], sizes = [8, 8], strides = [1, 1]} : vector<8x32xbf16> to vector<8x8xbf16>
    %96 = vector.extract_strided_slice %59 {offsets = [0, 16], sizes = [8, 8], strides = [1, 1]} : vector<8x32xbf16> to vector<8x8xbf16>
    %97 = vector.extract_strided_slice %61 {offsets = [0, 16], sizes = [8, 8], strides = [1, 1]} : vector<8x32xbf16> to vector<8x8xbf16>
    %cst_36 = arith.constant dense<0.000000e+00> : vector<8x8xf32>
    %98 = tpu.matmul %95, %96, %cst_36 {dimension_numbers = #tpu.dot_dimension_numbers<[1], [1], [0], [0], [0, 0, 1, 0], [], []>} : vector<8x8xbf16>, vector<8x8xbf16>, vector<8x8xf32> -> vector<8x8xf32>
    %cst_37 = arith.constant dense<0xFF800000> : vector<8xf32>
    %99 = vector.multi_reduction <maximumf>, %98, %cst_37 [1] : vector<8x8xf32> to vector<8xf32>
    %100 = vector.shape_cast %99 : vector<8xf32> to vector<8x1xf32>
    %101 = vector.broadcast %100 : vector<8x1xf32> to vector<8x8xf32>
    %102 = arith.subf %98, %101 : vector<8x8xf32>
    %103 = math.exp %102 : vector<8x8xf32>
    %cst_38 = arith.constant dense<0.000000e+00> : vector<8xf32>
    %104 = vector.multi_reduction <add>, %103, %cst_38 [1] : vector<8x8xf32> to vector<8xf32>
    %105 = vector.shape_cast %104 : vector<8xf32> to vector<8x1xf32>
    %106 = tpu.reciprocal %105 {approx = true} : vector<8x1xf32> -> vector<8x1xf32>
    %107 = vector.broadcast %106 : vector<8x1xf32> to vector<8x8xf32>
    %108 = arith.mulf %103, %107 : vector<8x8xf32>
    %109 = arith.truncf %108 : vector<8x8xf32> to vector<8x8xbf16>
    %cst_39 = arith.constant dense<0.000000e+00> : vector<8x8xf32>
    %110 = tpu.matmul %109, %97, %cst_39 {dimension_numbers = #tpu.dot_dimension_numbers<[1], [0], [0], [1], [0, 0, 1, 1], [], []>} : vector<8x8xbf16>, vector<8x8xbf16>, vector<8x8xf32> -> vector<8x8xf32>
    %111 = vector.extract_strided_slice %62 {offsets = [0, 24], sizes = [8, 8], strides = [1, 1]} : vector<8x32xbf16> to vector<8x8xbf16>
    %112 = vector.extract_strided_slice %59 {offsets = [0, 24], sizes = [8, 8], strides = [1, 1]} : vector<8x32xbf16> to vector<8x8xbf16>
    %113 = vector.extract_strided_slice %61 {offsets = [0, 24], sizes = [8, 8], strides = [1, 1]} : vector<8x32xbf16> to vector<8x8xbf16>
    %cst_40 = arith.constant dense<0.000000e+00> : vector<8x8xf32>
    %114 = tpu.matmul %111, %112, %cst_40 {dimension_numbers = #tpu.dot_dimension_numbers<[1], [1], [0], [0], [0, 0, 1, 0], [], []>} : vector<8x8xbf16>, vector<8x8xbf16>, vector<8x8xf32> -> vector<8x8xf32>
    %cst_41 = arith.constant dense<0xFF800000> : vector<8xf32>
    %115 = vector.multi_reduction <maximumf>, %114, %cst_41 [1] : vector<8x8xf32> to vector<8xf32>
    %116 = vector.shape_cast %115 : vector<8xf32> to vector<8x1xf32>
    %117 = vector.broadcast %116 : vector<8x1xf32> to vector<8x8xf32>
    %118 = arith.subf %114, %117 : vector<8x8xf32>
    %119 = math.exp %118 : vector<8x8xf32>
    %cst_42 = arith.constant dense<0.000000e+00> : vector<8xf32>
    %120 = vector.multi_reduction <add>, %119, %cst_42 [1] : vector<8x8xf32> to vector<8xf32>
    %121 = vector.shape_cast %120 : vector<8xf32> to vector<8x1xf32>
    %122 = tpu.reciprocal %121 {approx = true} : vector<8x1xf32> -> vector<8x1xf32>
    %123 = vector.broadcast %122 : vector<8x1xf32> to vector<8x8xf32>
    %124 = arith.mulf %119, %123 : vector<8x8xf32>
    %125 = arith.truncf %124 : vector<8x8xf32> to vector<8x8xbf16>
    %cst_43 = arith.constant dense<0.000000e+00> : vector<8x8xf32>
    %126 = tpu.matmul %125, %113, %cst_43 {dimension_numbers = #tpu.dot_dimension_numbers<[1], [0], [0], [1], [0, 0, 1, 1], [], []>} : vector<8x8xbf16>, vector<8x8xbf16>, vector<8x8xf32> -> vector<8x8xf32>
    %127 = tpu.concatenate %78, %94, %110, %126 in 1 : vector<8x8xf32>, vector<8x8xf32>, vector<8x8xf32>, vector<8x8xf32> -> vector<8x32xf32>
    %128 = arith.truncf %127 : vector<8x32xf32> to vector<8x32xbf16>
    %c0_44 = arith.constant 0 : index
    %c0_45 = arith.constant 0 : index
    %129 = vector.load %arg10[%c0_44, %c0_45] : memref<32x32xbf16, #tpu.memory_space<vmem>>, vector<32x32xbf16>
    %cst_46 = arith.constant dense<0.000000e+00> : vector<8x32xf32>
    %130 = tpu.matmul %128, %129, %cst_46 {dimension_numbers = #tpu.dot_dimension_numbers<[1], [0], [0], [1], [0, 0, 1, 1], [], []>} : vector<8x32xbf16>, vector<32x32xbf16>, vector<8x32xf32> -> vector<8x32xf32>
    %c0_47 = arith.constant 0 : index
    %c0_48 = arith.constant 0 : index
    %131 = vector.load %arg11[%c0_47, %c0_48] : memref<1x32xf32, #tpu.memory_space<vmem>>, vector<1x32xf32>
    %132 = vector.broadcast %131 : vector<1x32xf32> to vector<8x32xf32>
    %133 = arith.addf %130, %132 : vector<8x32xf32>
    %134 = arith.addf %1, %133 : vector<8x32xf32>
    %c0_49 = arith.constant 0 : index
    %c0_50 = arith.constant 0 : index
    %135 = vector.load %arg12[%c0_49, %c0_50] : memref<1x32xf32, #tpu.memory_space<vmem>>, vector<1x32xf32>
    %c0_51 = arith.constant 0 : index
    %c0_52 = arith.constant 0 : index
    %136 = vector.load %arg13[%c0_51, %c0_52] : memref<1x32xf32, #tpu.memory_space<vmem>>, vector<1x32xf32>
    %cst_53 = arith.constant dense<0.000000e+00> : vector<8xf32>
    %137 = vector.multi_reduction <add>, %134, %cst_53 [1] : vector<8x32xf32> to vector<8xf32>
    %138 = vector.shape_cast %137 : vector<8xf32> to vector<8x1xf32>
    %cst_54 = arith.constant 3.200000e+01 : f32
    %139 = vector.broadcast %cst_54 : f32 to vector<8x1xf32>
    %140 = arith.divf %138, %139 : vector<8x1xf32>
    %141 = vector.broadcast %140 : vector<8x1xf32> to vector<8x32xf32>
    %142 = arith.subf %134, %141 : vector<8x32xf32>
    %143 = arith.mulf %142, %142 : vector<8x32xf32>
    %cst_55 = arith.constant dense<0.000000e+00> : vector<8xf32>
    %144 = vector.multi_reduction <add>, %143, %cst_55 [1] : vector<8x32xf32> to vector<8xf32>
    %145 = vector.shape_cast %144 : vector<8xf32> to vector<8x1xf32>
    %cst_56 = arith.constant 3.200000e+01 : f32
    %146 = vector.broadcast %cst_56 : f32 to vector<8x1xf32>
    %147 = arith.divf %145, %146 : vector<8x1xf32>
    %cst_57 = arith.constant 9.99999974E-6 : f32
    %148 = vector.broadcast %cst_57 : f32 to vector<8x1xf32>
    %149 = arith.addf %147, %148 : vector<8x1xf32>
    %150 = math.rsqrt %149 : vector<8x1xf32>
    %151 = vector.broadcast %150 : vector<8x1xf32> to vector<8x32xf32>
    %152 = arith.mulf %142, %151 : vector<8x32xf32>
    %153 = vector.broadcast %135 : vector<1x32xf32> to vector<8x32xf32>
    %154 = arith.mulf %152, %153 : vector<8x32xf32>
    %155 = vector.broadcast %136 : vector<1x32xf32> to vector<8x32xf32>
    %156 = arith.addf %154, %155 : vector<8x32xf32>
    %157 = arith.truncf %156 : vector<8x32xf32> to vector<8x32xbf16>
    %c0_58 = arith.constant 0 : index
    %c0_59 = arith.constant 0 : index
    %158 = vector.load %arg14[%c0_58, %c0_59] : memref<32x128xbf16, #tpu.memory_space<vmem>>, vector<32x128xbf16>
    %cst_60 = arith.constant dense<0.000000e+00> : vector<8x128xf32>
    %159 = tpu.matmul %157, %158, %cst_60 {dimension_numbers = #tpu.dot_dimension_numbers<[1], [0], [0], [1], [0, 0, 1, 1], [], []>} : vector<8x32xbf16>, vector<32x128xbf16>, vector<8x128xf32> -> vector<8x128xf32>
    %c0_61 = arith.constant 0 : index
    %c0_62 = arith.constant 0 : index
    %160 = vector.load %arg15[%c0_61, %c0_62] : memref<1x128xf32, #tpu.memory_space<vmem>>, vector<1x128xf32>
    %161 = vector.broadcast %160 : vector<1x128xf32> to vector<8x128xf32>
    %162 = arith.addf %159, %161 : vector<8x128xf32>
    %cst_63 = arith.constant -1.702000e+00 : f32
    %163 = vector.broadcast %cst_63 : f32 to vector<8x128xf32>
    %164 = arith.mulf %163, %162 : vector<8x128xf32>
    %165 = math.exp %164 : vector<8x128xf32>
    %cst_64 = arith.constant 1.000000e+00 : f32
    %166 = vector.broadcast %cst_64 : f32 to vector<8x128xf32>
    %167 = arith.addf %166, %165 : vector<8x128xf32>
    %168 = tpu.reciprocal %167 {approx = true} : vector<8x128xf32> -> vector<8x128xf32>
    %169 = arith.mulf %162, %168 : vector<8x128xf32>
    %170 = arith.truncf %169 : vector<8x128xf32> to vector<8x128xbf16>
    %c0_65 = arith.constant 0 : index
    %c0_66 = arith.constant 0 : index
    %171 = vector.load %arg16[%c0_65, %c0_66] : memref<128x32xbf16, #tpu.memory_space<vmem>>, vector<128x32xbf16>
    %cst_67 = arith.constant dense<0.000000e+00> : vector<8x32xf32>
    %172 = tpu.matmul %170, %171, %cst_67 {dimension_numbers = #tpu.dot_dimension_numbers<[1], [0], [0], [1], [0, 0, 1, 1], [], []>} : vector<8x128xbf16>, vector<128x32xbf16>, vector<8x32xf32> -> vector<8x32xf32>
    %c0_68 = arith.constant 0 : index
    %c0_69 = arith.constant 0 : index
    %173 = vector.load %arg17[%c0_68, %c0_69] : memref<1x32xf32, #tpu.memory_space<vmem>>, vector<1x32xf32>
    %174 = vector.broadcast %173 : vector<1x32xf32> to vector<8x32xf32>
    %175 = arith.addf %172, %174 : vector<8x32xf32>
    %176 = arith.addf %134, %175 : vector<8x32xf32>
    %c0_70 = arith.constant 0 : index
    %c0_71 = arith.constant 0 : index
    %c0_72 = arith.constant 0 : index
    %177 = vector.load %arg18[%c0_70, %c0_71, %c0_72] : memref<1x8x32xf32, #tpu.memory_space<vmem>>, vector<1x8x32xf32>
    %178 = vector.shape_cast %177 : vector<1x8x32xf32> to vector<8x32xf32>
    %179 = vector.shape_cast %176 : vector<8x32xf32> to vector<1x8x32xf32>
    tpu.vector_store %arg18[%c0_70, %c0_71, %c0_72], %179 {strides = array<i32>} : memref<1x8x32xf32, #tpu.memory_space<vmem>>, vector<1x8x32xf32>,
    return
  }
  func.func @transform_0(%arg0: i32, %arg1: i32) -> (i32, i32, i32) {
    %c0_i32 = arith.constant 0 : i32
    %c0_i32_0 = arith.constant 0 : i32
    return %arg0, %arg1, %c0_i32 : i32, i32, i32
  }
  func.func @transform_1(%arg0: i32, %arg1: i32) -> (i32, i32, i32) {
    %c0_i32 = arith.constant 0 : i32
    %c0_i32_0 = arith.constant 0 : i32
    %c0_i32_1 = arith.constant 0 : i32
    return %arg0, %c0_i32, %c0_i32_0 : i32, i32, i32
  }
  func.func @transform_2(%arg0: i32, %arg1: i32) -> (i32, i32) {
    %c0_i32 = arith.constant 0 : i32
    %c0_i32_0 = arith.constant 0 : i32
    %c0_i32_1 = arith.constant 0 : i32
    return %c0_i32, %c0_i32_0 : i32, i32
  }
  func.func @transform_3(%arg0: i32, %arg1: i32) -> (i32, i32) {
    %c0_i32 = arith.constant 0 : i32
    %c0_i32_0 = arith.constant 0 : i32
    %c0_i32_1 = arith.constant 0 : i32
    return %c0_i32, %c0_i32_0 : i32, i32
  }
  func.func @transform_4(%arg0: i32, %arg1: i32) -> (i32, i32) {
    %c0_i32 = arith.constant 0 : i32
    %c0_i32_0 = arith.constant 0 : i32
    %c0_i32_1 = arith.constant 0 : i32
    return %c0_i32, %c0_i32_0 : i32, i32
  }
  func.func @transform_5(%arg0: i32, %arg1: i32) -> (i32, i32) {
    %c0_i32 = arith.constant 0 : i32
    %c0_i32_0 = arith.constant 0 : i32
    %c0_i32_1 = arith.constant 0 : i32
    return %c0_i32, %c0_i32_0 : i32, i32
  }
  func.func @transform_6(%arg0: i32, %arg1: i32) -> (i32, i32) {
    %c0_i32 = arith.constant 0 : i32
    %c0_i32_0 = arith.constant 0 : i32
    %c0_i32_1 = arith.constant 0 : i32
    return %c0_i32, %c0_i32_0 : i32, i32
  }
  func.func @transform_7(%arg0: i32, %arg1: i32) -> (i32, i32) {
    %c0_i32 = arith.constant 0 : i32
    %c0_i32_0 = arith.constant 0 : i32
    %c0_i32_1 = arith.constant 0 : i32
    return %c0_i32, %c0_i32_0 : i32, i32
  }
  func.func @transform_8(%arg0: i32, %arg1: i32) -> (i32, i32) {
    %c0_i32 = arith.constant 0 : i32
    %c0_i32_0 = arith.constant 0 : i32
    %c0_i32_1 = arith.constant 0 : i32
    return %c0_i32, %c0_i32_0 : i32, i32
  }
  func.func @transform_9(%arg0: i32, %arg1: i32) -> (i32, i32) {
    %c0_i32 = arith.constant 0 : i32
    %c0_i32_0 = arith.constant 0 : i32
    %c0_i32_1 = arith.constant 0 : i32
    return %c0_i32, %c0_i32_0 : i32, i32
  }
  func.func @transform_10(%arg0: i32, %arg1: i32) -> (i32, i32) {
    %c0_i32 = arith.constant 0 : i32
    %c0_i32_0 = arith.constant 0 : i32
    %c0_i32_1 = arith.constant 0 : i32
    return %c0_i32, %c0_i32_0 : i32, i32
  }
  func.func @transform_11(%arg0: i32, %arg1: i32) -> (i32, i32) {
    %c0_i32 = arith.constant 0 : i32
    %c0_i32_0 = arith.constant 0 : i32
    %c0_i32_1 = arith.constant 0 : i32
    return %c0_i32, %c0_i32_0 : i32, i32
  }
  func.func @transform_12(%arg0: i32, %arg1: i32) -> (i32, i32) {
    %c0_i32 = arith.constant 0 : i32
    %c0_i32_0 = arith.constant 0 : i32
    %c0_i32_1 = arith.constant 0 : i32
    return %c0_i32, %c0_i32_0 : i32, i32
  }
  func.func @transform_13(%arg0: i32, %arg1: i32) -> (i32, i32) {
    %c0_i32 = arith.constant 0 : i32
    %c0_i32_0 = arith.constant 0 : i32
    %c0_i32_1 = arith.constant 0 : i32
    return %c0_i32, %c0_i32_0 : i32, i32
  }
  func.func @transform_14(%arg0: i32, %arg1: i32) -> (i32, i32) {
    %c0_i32 = arith.constant 0 : i32
    %c0_i32_0 = arith.constant 0 : i32
    %c0_i32_1 = arith.constant 0 : i32
    return %c0_i32, %c0_i32_0 : i32, i32
  }
  func.func @transform_15(%arg0: i32, %arg1: i32) -> (i32, i32) {
    %c0_i32 = arith.constant 0 : i32
    %c0_i32_0 = arith.constant 0 : i32
    %c0_i32_1 = arith.constant 0 : i32
    return %c0_i32, %c0_i32_0 : i32, i32
  }
  func.func @transform_16(%arg0: i32, %arg1: i32) -> (i32, i32, i32) {
    %c0_i32 = arith.constant 0 : i32
    %c0_i32_0 = arith.constant 0 : i32
    return %arg0, %arg1, %c0_i32 : i32, i32, i32
  }
}

</mosaic_0001>

<bundles_post_ra>
// kernel: tpu_custom_call.1
= control target key start
LH: loop header
LB: loop body
LE: loop exit
PB: predicated region body
PF: predicated region fallthrough
CT: control target
= control target key end

     0   :  { %s2726_s0 = inlined_call_operand.vmem [shape: f32[2,8,32], index: 0, kind: input, shape index: {}]   ;;  %s2727_s1 = inlined_call_operand.vmem [shape: f32[2,8,32], index: 1, kind: input, shape index: {}]   ;;  %s2728_s2 = inlined_call_operand.hbm [shape: f32[1,32], index: 2, kind: input, shape index: {}]   ;;  %s2729_s3 = inlined_call_operand.hbm [shape: f32[1,32], index: 3, kind: input, shape index: {}]   ;;  %s2730_s4 = inlined_call_operand.vmem [shape: bf16[32,32], index: 4, kind: input, shape index: {}]   ;;  %s2731_s5 = inlined_call_operand.hbm [shape: f32[1,32], index: 5, kind: input, shape index: {}]   ;;  %s2732_s6 = inlined_call_operand.vmem [shape: bf16[32,64], index: 6, kind: input, shape index: {}]   ;;  %s2733_s7 = inlined_call_operand.hbm [shape: f32[1,64], index: 7, kind: input, shape index: {}]   ;;  %s2734_s8 = inlined_call_operand.vmem [shape: bf16[32,32], index: 8, kind: input, shape index: {}]   ;;  %s2735_s9 = inlined_call_operand.hbm [shape: f32[1,32], index: 9, kind: input, shape index: {}]   ;;  %s2736_s10 = inlined_call_operand.vmem [shape: f32[1,32], index: 10, kind: input, shape index: {}]   ;;  %s2737_s11 = inlined_call_operand.vmem [shape: f32[1,32], index: 11, kind: input, shape index: {}]   ;;  %s2738_s12 = inlined_call_operand.vmem [shape: bf16[32,128], index: 12, kind: input, shape index: {}]   ;;  %s2739_s13 = inlined_call_operand.vmem [shape: f32[1,128], index: 13, kind: input, shape index: {}]   ;;  %s2740_s14 = inlined_call_operand.vmem [shape: bf16[128,32], index: 14, kind: input, shape index: {}]   ;;  %s2741_s15 = inlined_call_operand.vmem [shape: f32[1,32], index: 15, kind: input, shape index: {}]   ;;  %s2742_s16 = inlined_call_operand.hbm [shape: f32[2,8,32], index: 16, kind: output, shape index: {}]  }
   0x1   :  { %2755 = sst [smem:[#allocation23_spill]] %s2726_s0 }
   0x2   :  { %2756 = sst [smem:[#allocation24_spill]] %s2729_s3 }
   0x3   :  { %2757 = sst [smem:[#allocation25_spill]] %s2742_s16 }
   0x4   :  { %21 = vsyncpa [#allocation3], 0 }
   0x5   :  { %22 = vsyncpa [#allocation6], 0 }
   0x6   :  { %23 = vsyncpa [#allocation9], 0 }
   0x7   :  { %24 = vsyncpa [#allocation4], 0 }
   0x8   :  { %26 = vsyncpa [#allocation4 + $0x1], 0  ;;  %s2375_s21 = smov 0   ;;  %s2377_s22 = smov 0  }
   0x9   :  { %s2379_s23 = smov 0   ;;  %s2381_s24 = smov 0  }
   0xa   :  { %s2383_s25 = smov 0   ;;  %s2385_s26 = smov 0  }
   0xb LB: > { %2758 = sst [smem:[#allocation16_spill]] %s2250_s21  ;;  %s1696_s27 = sadd.s32 4294967295, %s2270_s26   ;;  %s2270_s26 = sphi %s2385_s26, %s32_s26   ;;  %s2266_s25 = sphi %s2383_s25, %s2785_s25   ;;  %s2262_s24 = sphi %s2381_s24, %s2784_s24   ;;  %s2258_s23 = sphi %s2379_s23, %s2783_s23   ;;  %s2254_s22 = sphi %s2377_s22, %s2787_s22   ;;  %s2250_s21 = sphi %s2375_s21, %s2786_s21  }
   0xc   : > { %2759 = sst [smem:[#allocation17_spill]] %s2258_s23  ;;  %s1697_s28 = sadd.s32 4294967294, %s2270_s26  }
   0xd   : > { %2760 = sst [smem:[#allocation18_spill]] %s2266_s25  ;;  %s44_s29 = sadd.s32 1, %s2266_s25 }
   0xe   : > { %2761 = sst [smem:[#allocation19_spill]] %s2270_s26  ;;  %s401_s30 = sadd.s32 1, %s2258_s23 }
   0xf   : > { %p46_p0 = scmp.ge.s32.totalorder %s44_s29, 2  ;;  %p411_p1 = scmp.ne.s32.totalorder %s2258_s23, %s2254_s22 }
  0x10   : > { %p412_p2 = scmp.eq.s32.totalorder %s1696_s27, 1  ;;  %p417_p3 = scmp.ne.s32.totalorder %s2254_s22, %s2250_s21 }
  0x11   : > { %s2789_s29 = smov (%p46_p0, %s44_s29), 0  ;;  %p418_p5 = scmp.eq.s32.totalorder %s1697_s28, 1 }
  0x12   : > { %2762 = sst [smem:[#allocation20_spill]] %s2789_s29  ;;  %p2415_p4 = por %p412_p2, %p411_p1 }
  0x13   : > { %s396_s17 = ssub.s32 %s2266_s25, %s2789_s29  ;;  %p1698_p6 = scmp.ge.s32.totalorder %s2270_s26, 1 }
  0x14   : > { %s2763_s0 = scalar_select %p2415_p4, 1, 0 }
  0x15   : > { %p399_p7 = scmp.eq.s32.totalorder %s396_s17, 0  ;;  %p2422_p8 = por %p418_p5, %p417_p3 }
  0x16   : > { %p425_p9 = scmp.lt.s32.totalorder %s2270_s26, 3  ;;  %p2434_p11 = scmp.eq.s32.totalorder %s1696_s27, 0 }
  0x17   : > { %s2764_s18 = scalar_select %p2422_p8, 1, 0 }
  0x18   : > { %s2428_s19 = scalar_select %p399_p7, %s2258_s23, %s401_s30  }
  0x19   : > { %2765 = sst [smem:[#allocation21_spill]] %s2764_s18  ;;  %p2430_p10 = pnand %p1698_p6, %p425_p9 }
  0x1a   : > { %2766 = sst [smem:[#allocation22_spill]] %s2428_s19  ;;  %s2272_s28 = smov [#allocation5]  }
  0x1b   : > { %s2767_s20 = scalar_select %p2430_p10, 1, 0 }
  0x1c   : > { %s2768_s21 = scalar_select %p2434_p11, 1, 0 }
  0x1d   : > { %p1914_p12 = pneg %p2430_p10  ;;  %s449_s17 = sshll.u32 %s2272_s28, 4  ;;  %s450_s17 = int_to_ptr.vmem [resolvable:$true] %s449_s17 }
  0x1e   : > { %s2273_s29 = smov [#allocation8]   ;;  %s2063_s19 = scalar_lea.vmem %s450_s17, 16 }
  0x1f   : > { %s477_s25 = sshll.u32 %s2273_s29, 4  ;;  %p2442_p13 = pnand %p2434_p11, %p1914_p12  ;;  %s478_s25 = int_to_ptr.vmem [resolvable:$true] %s477_s25 }
  0x20   : > { %p2064_p1 = scmp.ne.s32.totalorder %s450_s17, %s2063_s19  ;;  %s2070_s28 = scalar_lea.vmem %s450_s17, 32 }
  0x21   : > { %p2448_p0 = pneg %p2442_p13  ;;  %p2071_p5 = scmp.lt.s32.totalorder %s450_s17, %s450_s17 }
  0x22   : > { %p2072_p6 = scmp.lt.s32.totalorder %s2070_s28, %s2063_s19 }
  0x23   : > { %p2066_p2 = pnand %p2064_p1, %p2448_p0 }
  0x24   : > { %p2073_p7 = por %p2072_p6, %p2071_p5 }
  0x25   : > { %p2067_p3 = pneg %p2066_p2 }
  0x27   : > { %p2074_p9 = pnand %p2073_p7, %p2067_p3 }
  0x29   : > { %2077 = shalt.err (!%p2074_p9)
}
  0x2a   : > { %s2771_s3 = sld [smem:[#allocation24_spill]]  ;;  %s2089_s18 = scalar_lea.vmem %s478_s25, 16 }
  0x2b   : > { %p2090_p12 = scmp.ne.s32.totalorder %s478_s25, %s2089_s18  ;;  %s2096_s26 = scalar_lea.vmem %s478_s25, 32 }
  0x2c   : > { %p2097_p1 = scmp.lt.s32.totalorder %s478_s25, %s478_s25  ;;  %p2098_p2 = scmp.lt.s32.totalorder %s2096_s26, %s2089_s18 }
  0x2d   : > { %p2092_p8 = pnand %p2090_p12, %p2448_p0 }
  0x2e   : > { %p2099_p11 = por %p2098_p2, %p2097_p1 }
  0x2f   : > { %p2093_p4 = pneg %p2092_p8 }
  0x30   : > { %1920 = dma.hbm_to_vmem [thread:$0]  (!%p2442_p13), %s2771_s3, 16, %s450_s17, [#allocation6]  }
  0x31   : > { %p2100_p10 = pnand %p2099_p11, %p2093_p4 }
  0x33   : > { %2103 = shalt.err (!%p2100_p10)
}
  0x34   : > { %1926 = dma.hbm_to_vmem [thread:$0]  (!%p2442_p13), %s2733_s7, 16, %s478_s25, [#allocation9]  }
  0x35   : > { %s2274_s23 = smov [#allocation2]   ;;  %s2275_s29 = smov [#allocation7]  }
  0x36   : > { %s438_s17 = sshll.u32 %s2274_s23, 4  ;;  %s463_s3 = sshll.u32 %s2275_s29, 4  ;;  %s439_s17 = int_to_ptr.vmem [resolvable:$true] %s438_s17  ;;  %s464_s3 = int_to_ptr.vmem [resolvable:$true] %s463_s3 }
  0x37   : > { %s2115_s16 = scalar_lea.vmem %s439_s17, 16  ;;  %s2122_s26 = scalar_lea.vmem %s439_s17, 32 }
  0x38   : > { %p2116_p8 = scmp.ne.s32.totalorder %s439_s17, %s2115_s16  ;;  %p2123_p4 = scmp.lt.s32.totalorder %s439_s17, %s439_s17 }
  0x39   : > { %p2124_p10 = scmp.lt.s32.totalorder %s2122_s26, %s2115_s16 }
  0x3a   : > { %p2118_p3 = pnand %p2116_p8, %p2448_p0 }
  0x3b   : > { %p2125_p11 = por %p2124_p10, %p2123_p4 }
  0x3c   : > { %p2119_p5 = pneg %p2118_p3 }
  0x3e   : > { %p2126_p6 = pnand %p2125_p11, %p2119_p5 }
  0x40   : > { %2129 = shalt.err (!%p2126_p6)
}
  0x41   : > { %1917 = dma.hbm_to_vmem [thread:$0]  (!%p2442_p13), %s2728_s2, 16, %s439_s17, [#allocation3]  }
  0x42   : > { %s2141_s19 = scalar_lea.vmem %s464_s3, 16  ;;  %s2148_s28 = scalar_lea.vmem %s464_s3, 32 }
  0x43   : > { %p2142_p7 = scmp.ne.s32.totalorder %s464_s3, %s2141_s19  ;;  %p2149_p1 = scmp.lt.s32.totalorder %s464_s3, %s464_s3 }
  0x44   : > { %p2150_p2 = scmp.lt.s32.totalorder %s2148_s28, %s2141_s19 }
  0x45   : > { %p2144_p9 = pnand %p2142_p7, %p2448_p0 }
  0x46   : > { %p2151_p8 = por %p2150_p2, %p2149_p1 }
  0x47   : > { %p2145_p12 = pneg %p2144_p9 }
  0x49   : > { %p2152_p3 = pnand %p2151_p8, %p2145_p12 }
  0x4b   : > { %2155 = shalt.err (!%p2152_p3)
}
  0x4c   : > { %1923 = dma.hbm_to_vmem [thread:$0]  (!%p2442_p13), %s2731_s5, 16, %s464_s3, [#allocation6]  }
  0x4d   : > { %s2276_s17 = smov [#allocation10]  }
  0x4e   : > { %s491_s29 = sshll.u32 %s2276_s17, 4  ;;  %s492_s29 = int_to_ptr.vmem [resolvable:$true] %s491_s29 }
  0x4f   : > { %s2167_s26 = scalar_lea.vmem %s492_s29, 16  ;;  %s2174_s18 = scalar_lea.vmem %s492_s29, 32 }
  0x50   : > { %p2168_p5 = scmp.ne.s32.totalorder %s492_s29, %s2167_s26  ;;  %p2175_p11 = scmp.lt.s32.totalorder %s492_s29, %s492_s29 }
  0x51   : > { %p2176_p6 = scmp.lt.s32.totalorder %s2174_s18, %s2167_s26 }
  0x52   : > { %p2170_p4 = pnand %p2168_p5, %p2448_p0 }
  0x53   : > { %p2177_p7 = por %p2176_p6, %p2175_p11 }
  0x54   : > { %p2171_p10 = pneg %p2170_p4 }
  0x56   : > { %p2178_p9 = pnand %p2177_p7, %p2171_p10 }
  0x58   : > { %2181 = shalt.err (!%p2178_p9)
}
  0x59   : > { %1929 = dma.hbm_to_vmem [thread:$0]  (!%p2442_p13), %s2735_s9, 16, %s492_s29, [#allocation9]  }
  0x5a   : > { %p2772_p12 = scmp.ne.s32.totalorder %s2767_s20, 0 }
  0x5b   : > { %p2773_p1 = scmp.ne.s32.totalorder (!%p2772_p12), %s2768_s21, 0 }
  0x5c   : > { %539 = sbr.rel (%p2772_p12) target bundleno = 2574 (0xa0e), region = 84 }
  0x61   : > { %2233 = dma.done.wait (%p2773_p1), [#allocation3], 16  }
  0x62   : > { %2235 = vsyncadd (%p2773_p1), [#allocation3], 4294967280 }
  0x63   : > { %2237 = dma.done.wait (%p2773_p1), [#allocation6], 32  }
  0x64   : > { %2239 = vsyncadd (%p2773_p1), [#allocation6], 4294967264 }
  0x65   : > { %2241 = dma.done.wait (%p2773_p1), [#allocation9], 32  }
  0x66   : > { %2243 = vsyncadd (%p2773_p1), [#allocation9], 4294967264  ;;  %p611_p13 = scmp.lt.s32.totalorder %s2262_s24, 1  ;;  %s2774_s28 = sld [smem:[#allocation23_spill]]  ;;  %vm627_vm0 = vcmask 261120   ;;  %v2010_v14 = vld [vmem:[%s2730_s4 + $0x8] sm:$0xff]  }
  0x67   : > { %v2277_v15 = vmov 0.0   ;;  %vm2278_vm1 = vmmov 0   ;;  %v2011_v16 = vld [vmem:[%s2730_s4] sm:$0xff]   ;;  %v2012_v31 = vld [vmem:[%s2732_s6 + $0x8] sm:$0xff]   ;;  %s2279_s27 = smov 120   ;;  %vm807_vm2 = vcmask 64512  }
  0x68   : > { %s612_s3 = scalar_select %p611_p13, %s2262_s24, 1  ;;  %1792 = vmatprep.subr.bf16.mxu1 %v2277_v15  ;;  %1796 = vmatprep.mubr.msk.bf16.mxu1 %vm2278_vm1, %v2277_v15  ;;  %v1714_v24 = vld [vmem:[#allocation2] ss:$0 sm:$0xff]  ;;  %v1715_v26 = vld [vmem:[#allocation5] ss:$0 sm:$0xff]  ;;  %vm872_vm3 = vcmask 1043456  }
  0x69   : > { %1793 = vmatpush3.bf16.msra.mxu1 %v2010_v14  ;;  %1820 = vmatprep.subr.bf16.mxu0 %v2277_v15  ;;  %v2013_v34 = vld [vmem:[%s2732_s6] sm:$0xff]   ;;  %s2282_s23 = smov 88   ;;  %s2283_s17 = smov 80   ;;  %vm1260_vm4 = vcmask 130048   ;;  %vm1262_vm5 = vcmask 195584  }
  0x6a   : > { %s1712_s20 = sshll.u32 %s612_s3, 3  ;;  %1794 = vmatprep.subr.bf16.mxu1 %v2277_v15  ;;  %1822 = vmatprep.mubr.msk.bf16.mxu0 %vm2278_vm1, %v2277_v15  ;;  %v1716_v37 = vld [vmem:[#allocation7] ss:$0 sm:$0xff]  ;;  %v1720_v44 = vld [vmem:[#allocation8] ss:$0 sm:$0xff]  ;;  %s2285_s21 = smov 72  }
  0x6b   : > { %s621_s29 = scalar_lea.vmem %s2727_s1, %s1712_s20  ;;  %s2286_s3 = smov 8  }
  0x6c   : > { %s617_s16 = scalar_lea.vmem %s2774_s28, %s1712_s20  ;;  %v624_v1 = vld [vmem:[%s621_s29] sm:$0xff]  ;;  %s2280_s28 = smov 112  }
  0x6d   : > { %v2509_v0 = vld [vmem:[%s617_s16] sm:$0xff]  ;;  %v723_v3 = vsel %vm627_vm0, %v624_v1, 0.0  ;;  %1795 = vmatpush3.bf16.msra.mxu1 %v2011_v16  ;;  %s2281_s16 = smov 104   ;;  %s2284_s29 = smov 96  }
  0x6e   : > { %v628_v2 = vsel %vm627_vm0, %v2509_v0, 0.0  ;;  %1800 = vmatprep.subr.bf16.mxu1 %v2277_v15  ;;  %s2287_s20 = smov 16   ;;  %s2288_s30 = smov 24  }
  0x6f   : > { %629 = vadd.xlane.f32.xlu0 %v628_v2  ;;  %s2775_s26 = sld [smem:[#allocation25_spill]]  ;;  %p2777_p2 = scmp.ne.s32.totalorder %s2763_s0, 0 }
  0x73   : > { %724 = vadd.xlane.f32.xlu0 %v723_v3 }
  0x75   : > { %s2776_s18 = smov %s2775_s26 }
  0xf8   : > { %v630_v4 = vpop.xlane.xlu0 %629 }
  0xf9   : > { %v632_v5 = vmul.f32 0.03125, %v630_v4 }
  0xfb   : > { %v633_v6 = vsub.f32 %v2509_v0, %v632_v5 }
  0xfc   : > { %v725_v7 = vpop.xlane.xlu0 %724 }
  0xfd   : > { %v726_v8 = vmul.f32 0.03125, %v725_v7  ;;  %v634_v9 = vmul.f32 %v633_v6, %v633_v6 }
  0xff   : > { %v727_v10 = vsub.f32 %v624_v1, %v726_v8  ;;  %v635_v11 = vsel %vm627_vm0, %v634_v9, 0.0 }
 0x100   : > { %636 = vadd.xlane.f32.xlu1 %v635_v11 }
 0x101   : > { %v728_v12 = vmul.f32 %v727_v10, %v727_v10 }
 0x103   : > { %v729_v13 = vsel %vm627_vm0, %v728_v12, 0.0 }
 0x104   : > { %730 = vadd.xlane.f32.xlu1 %v729_v13 }
 0x189   : > { %v637_v17 = vpop.xlane.xlu1 %636 }
 0x18a   : > { %v638_v18 = vmul.f32 0.03125, %v637_v17 }
 0x18c   : > { %v639_v19 = vadd.f32 1e-05, %v638_v18 }
 0x18d   : > { %v731_v20 = vpop.xlane.xlu1 %730 }
 0x18e   : > { %2026 = vrsqrt.f32 %v639_v19  ;;  %v732_v21 = vmul.f32 0.03125, %v731_v20 }
 0x190   : > { %v733_v22 = vadd.f32 1e-05, %v732_v21 }
 0x192   : > { %2028 = vrsqrt.f32 %v733_v22 }
 0x19b   : > { %v2027_v23 = vpop.eup %2026 }
 0x19c   : > { %v641_v25 = vmul.f32 %v2027_v23, %v633_v6 }
 0x19e   : > { %v648_v27 = vmul.f32 %v1714_v24, %v641_v25 }
 0x19f   : > { %v2029_v28 = vpop.eup %2028 }
 0x1a0   : > { %v655_v29 = vadd.f32 %v1715_v26, %v648_v27  ;;  %v735_v30 = vmul.f32 %v2029_v28, %v727_v10 }
 0x1a2   : > { %v656_v32 = vpack.c.bf16 %v655_v29, %v655_v29  ;;  %v736_v33 = vmul.f32 %v1714_v24, %v735_v30 }
 0x1a4   : > { %1797 = vmatmul.mubr.msk.bf16.vlgmr.msra.gmra.mxu1 %vm627_vm0, %v656_v32  ;;  %v737_v35 = vadd.f32 %v1715_v26, %v736_v33 }
 0x1a5   : > { %1801 = vmatpush3.bf16.msra.mxu1 %v2012_v31  ;;  %1804 = vmatprep.mubr.msk.bf16.mxu1 %vm2278_vm1, %v2277_v15 }
 0x1a6   : > { %1802 = vmatprep.subr.bf16.mxu1 %v2277_v15  ;;  %v738_v36 = vpack.c.bf16 %v737_v35, %v737_v35 }
 0x1a9   : > { %1803 = vmatpush3.bf16.msra.mxu1 %v2013_v34 }
 0x1aa   : > { %1808 = vmatprep.subr.bf16.mxu1 %v2277_v15 }
 0x1ac   : > { %1805 = vmatmul.mubr.msk.bf16.vlgmr.msra.gmra.mxu1 %vm627_vm0, %v738_v36 }
 0x1ad   : > { %1810 = vmatprep.mubr.msk.bf16.mxu1 %vm2278_vm1, %v2277_v15 }
 0x264   : > { %v717_v38 = vpop.f32.mrf.mxu1 }
 0x265   : > { %v718_v39 = vadd.f32 %v1716_v37, %v717_v38 }
 0x266   : > { %v1798_v40 = vpop.f32.mrf.mxu1 }
 0x267   : > { %v806_v41 = vpack.c.bf16 %v718_v39, %v718_v39 }
 0x268   : > { %v720_v42 = vpop.f32.mrf.mxu1 }
 0x269   : > { %917 = vrot.lane.b32.xlu1 %v806_v41, %s2279_s27 }
 0x26a   : > { %v1799_v43 = vpop.f32.mrf.mxu1 }
 0x26c   : > { %v799_v45 = vpop.f32.mrf.mxu1 }
 0x26d   : > { %v800_v46 = vadd.f32 %v1720_v44, %v799_v45 }
 0x26e   : > { %v1806_v47 = vpop.f32.mrf.mxu1 }
 0x26f   : > { %v2545_v48 = vpack.c.bf16 %v800_v46, %v800_v46 }
 0x270   : > { %v802_v49 = vpop.f32.mrf.mxu1 }
 0x271   : > { %1029 = vrot.lane.b32.xlu1 %v2545_v48, %s2280_s28  ;;  %919 = vrot.lane.b32.xlu0 %v2545_v48, %s2279_s27  ;;  %v812_v50 = vsel %vm807_vm2, %v2545_v48, 0 }
 0x272   : > { %v1807_v51 = vpop.f32.mrf.mxu1  ;;  %1809 = vmatpush3.bf16.xpose.msra.mxu1 %v812_v50 }
 0x273   : > { %1814 = vmatprep.subr.bf16.mxu1 %v2277_v15 }
 0x275   : > { %1027 = vrot.lane.b32.xlu1 %v806_v41, %s2280_s28  ;;  %1139 = vrot.lane.b32.xlu0 %v2545_v48, %s2281_s16 }
 0x279   : > { %1137 = vrot.lane.b32.xlu1 %v806_v41, %s2281_s16  ;;  %1811 = vmatmul.mubr.msk.bf16.vlgmr.msra.gmra.mxu1 %vm807_vm2, %v806_v41  ;;  %s1752_s16 = sshll.u32 %s2262_s24, 7 }
 0x27a   : > { %1816 = vmatprep.mubr.msk.bf16.mxu1 %vm2278_vm1, %v2277_v15  ;;  %s2679_s25 = scalar_lea.hbm %s2775_s26, %s1752_s16 }
 0x2db   : > { %v918_v54 = vpop.permute.xlu1 %917 }
 0x2e3   : > { %v920_v52 = vpop.permute.xlu0 %919  ;;  %v1030_v55 = vpop.permute.xlu1 %1029 }
 0x2e4   : > { %v925_v53 = vsel %vm807_vm2, %v920_v52, 0  ;;  %v1035_v56 = vsel %vm807_vm2, %v1030_v55, 0 }
 0x2e5   : > { %1821 = vmatpush3.bf16.xpose.msra.mxu0 %v925_v53 }
 0x2e6   : > { %1832 = vmatprep.subr.bf16.mxu0 %v2277_v15 }
 0x2e7   : > { %v1140_v57 = vpop.permute.xlu0 %1139  ;;  %v1028_v58 = vpop.permute.xlu1 %1027 }
 0x2e8   : > { %v1145_v59 = vsel %vm807_vm2, %v1140_v57, 0 }
 0x2eb   : > { %v1138_v60 = vpop.permute.xlu1 %1137 }
 0x2ec   : > { %1823 = vmatmul.mubr.msk.bf16.vlgmr.msra.gmra.mxu0 %vm807_vm2, %v918_v54 }
 0x2ed   : > { %1833 = vmatpush3.bf16.xpose.msra.mxu0 %v1035_v56  ;;  %1834 = vmatprep.mubr.msk.bf16.mxu0 %vm2278_vm1, %v2277_v15 }
 0x2ee   : > { %1844 = vmatprep.subr.bf16.mxu0 %v2277_v15 }
 0x2f4   : > { %1835 = vmatmul.mubr.msk.bf16.vlgmr.msra.gmra.mxu0 %vm807_vm2, %v1028_v58 }
 0x2f5   : > { %1845 = vmatpush3.bf16.xpose.msra.mxu0 %v1145_v59  ;;  %1846 = vmatprep.mubr.msk.bf16.mxu0 %vm2278_vm1, %v2277_v15 }
 0x2f6   : > { %1856 = vmatprep.subr.bf16.mxu0 %v2277_v15 }
 0x2fc   : > { %1847 = vmatmul.mubr.msk.bf16.vlgmr.msra.gmra.mxu0 %vm807_vm2, %v1138_v60 }
 0x2fd   : > { %1860 = vmatprep.mubr.msk.bf16.mxu0 %vm2278_vm1, %v2277_v15 }
 0x339   : > { %v848_v61 = vpop.f32.mrf.mxu1 }
 0x33a   : > { %v854_v62 = vsel %vm807_vm2, %v848_v61, -inf }
 0x33b   : > { %855 = vmax.xlane.f32.xlu0 %v854_v62  ;;  %v1812_v63 = vpop.f32.mrf.mxu1 }
 0x33d   : > { %v851_v1 = vpop.f32.mrf.mxu1 }
 0x33f   : > { %v1813_v2 = vpop.f32.mrf.mxu1 }
 0x3ac   : > { %v961_v3 = vpop.f32.mrf.mxu0 }
 0x3ad   : > { %v967_v4 = vsel %vm807_vm2, %v961_v3, -inf }
 0x3ae   : > { %968 = vmax.xlane.f32.xlu1 %v967_v4  ;;  %v1824_v5 = vpop.f32.mrf.mxu0 }
 0x3af   : > { %v2015_v5 = vld [vmem:[%s2734_s8] sm:$0xff]  }
 0x3b0   : > { %v964_v6 = vpop.f32.mrf.mxu0 }
 0x3b2   : > { %v1825_v7 = vpop.f32.mrf.mxu0 }
 0x3b4   : > { %v1071_v8 = vpop.f32.mrf.mxu0 }
 0x3b5   : > { %v1077_v9 = vsel %vm807_vm2, %v1071_v8, -inf }
 0x3b6   : > { %1078 = vmax.xlane.f32.xlu0 %v1077_v9  ;;  %v1836_v10 = vpop.f32.mrf.mxu0 }
 0x3b8   : > { %v1074_v11 = vpop.f32.mrf.mxu0 }
 0x3ba   : > { %v1837_v12 = vpop.f32.mrf.mxu0 }
 0x3bc   : > { %v1181_v13 = vpop.f32.mrf.mxu0 }
 0x3bd   : > { %v1187_v14 = vsel %vm807_vm2, %v1181_v13, -inf }
 0x3be   : > { %1188 = vmax.xlane.f32.xlu0 %v1187_v14  ;;  %v1848_v16 = vpop.f32.mrf.mxu0 }
 0x3c0   : > { %v1184_v17 = vpop.f32.mrf.mxu0 }
 0x3c2   : > { %v1849_v18 = vpop.f32.mrf.mxu0 }
 0x3c4   : > { %v856_v19 = vpop.xlane.xlu0 %855 }
 0x3c5   : > { %v857_v20 = vsub.f32 %v848_v61, %v856_v19 }
 0x3c7   : > { %v858_v21 = vmul.f32 1.442695, %v857_v20 }
 0x3c9   : > { %2030 = vpow2.f32 %v858_v21 }
 0x3d6   : > { %v2031_v22 = vpop.eup %2030 }
 0x3d7   : > { %v860_v23 = vsel %vm807_vm2, %v2031_v22, 0.0 }
 0x3d8   : > { %861 = vadd.xlane.f32.xlu0 %v860_v23 }
 0x437   : > { %v969_v24 = vpop.xlane.xlu1 %968 }
 0x438   : > { %v970_v25 = vsub.f32 %v961_v3, %v969_v24  ;;  %v2014_v3 = vld [vmem:[%s2734_s8 + $0x8] sm:$0xff]  }
 0x439   : > { %1857 = vmatpush3.bf16.msra.mxu0 %v2014_v3 }
 0x43a   : > { %v971_v26 = vmul.f32 1.442695, %v970_v25  ;;  %1858 = vmatprep.subr.bf16.mxu0 %v2277_v15 }
 0x43c   : > { %2032 = vpow2.f32 %v971_v26  ;;  %v1732_v26 = vld [vmem:[#allocation10] ss:$0 sm:$0xff] }
 0x43d   : > { %1859 = vmatpush3.bf16.msra.mxu0 %v2015_v5 }
 0x43e   : > { %1872 = vmatprep.subr.bf16.mxu0 %v2277_v15 }
 0x43f   : > { %v1079_v27 = vpop.xlane.xlu0 %1078 }
 0x440   : > { %v1080_v28 = vsub.f32 %v1071_v8, %v1079_v27 }
 0x442   : > { %v1081_v29 = vmul.f32 1.442695, %v1080_v28 }
 0x444   : > { %2034 = vpow2.f32 %v1081_v29 }
 0x447   : > { %v1189_v34 = vpop.xlane.xlu0 %1188 }
 0x448   : > { %v1190_v35 = vsub.f32 %v1181_v13, %v1189_v34 }
 0x449   : > { %v2033_v30 = vpop.eup %2032 }
 0x44a   : > { %v973_v31 = vsel %vm807_vm2, %v2033_v30, 0.0  ;;  %v1191_v36 = vmul.f32 1.442695, %v1190_v35 }
 0x44b   : > { %974 = vadd.xlane.f32.xlu1 %v973_v31 }
 0x44c   : > { %2036 = vpow2.f32 %v1191_v36 }
 0x451   : > { %v2035_v32 = vpop.eup %2034 }
 0x452   : > { %v1083_v33 = vsel %vm807_vm2, %v2035_v32, 0.0 }
 0x453   : > { %1084 = vadd.xlane.f32.xlu0 %v1083_v33 }
 0x459   : > { %v2037_v37 = vpop.eup %2036 }
 0x45a   : > { %v1193_v38 = vsel %vm807_vm2, %v2037_v37, 0.0 }
 0x45c   : > { %979 = vrot.lane.b32.xlu1 %v2545_v48, %s2282_s23 }
 0x460   : > { %1089 = vrot.lane.b32.xlu1 %v2545_v48, %s2283_s17 }
 0x461   : > { %v862_v39 = vpop.xlane.xlu0 %861 }
 0x462   : > { %2038 = vrcp.f32 %v862_v39  ;;  %v2016_v39 = vld [vmem:[%s2738_s12 + $0x8] sm:$0xff]  }
 0x469   : > { %867 = vrot.lane.b32.xlu0 %v2545_v48, %s2284_s29 }
 0x46f   : > { %v2039_v41 = vpop.eup %2038 }
 0x470   : > { %v864_v43 = vmul.f32 %v2039_v41, %v2031_v22 }
 0x472   : > { %v865_v47 = vpack.c.bf16 %v864_v43, %v864_v43 }
 0x484   : > { %1194 = vadd.xlane.f32.xlu1 %v1193_v38 }
 0x495   : > { %1199 = vrot.lane.b32.xlu1 %v2545_v48, %s2285_s21 }
 0x4d4   : > { %v975_v40 = vpop.xlane.xlu1 %974 }
 0x4d5   : > { %2040 = vrcp.f32 %v975_v40 }
 0x4d8   : > { %v980_v46 = vpop.permute.xlu1 %979 }
 0x4d9   : > { %v985_v48 = vsel %vm872_vm3, %v980_v46, 0  ;;  %v1737_v46 = vld [vmem:[%s2737_s11] ss:$0 sm:$0xff] }
 0x4dc   : > { %v1085_v42 = vpop.xlane.xlu0 %1084  ;;  %v1090_v51 = vpop.permute.xlu1 %1089 }
 0x4dd   : > { %2042 = vrcp.f32 %v1085_v42  ;;  %v1095_v54 = vsel %vm872_vm3, %v1090_v51, 0  ;;  %v2019_v51 = vld [vmem:[%s2740_s14 + $0x30] sm:$0xff]  }
 0x4e0   : > { %v868_v44 = vpop.permute.xlu0 %867 }
 0x4e1   : > { %v874_v45 = vsel %vm872_vm3, %v868_v44, 0  ;;  %v1736_v44 = vld [vmem:[%s2736_s10] ss:$0 sm:$0xff] }
 0x4e2   : > { %1815 = vmatpush3.bf16.msra.mxu1 %v874_v45  ;;  %v2041_v49 = vpop.eup %2040 }
 0x4e3   : > { %1826 = vmatprep.subr.bf16.mxu1 %v2277_v15  ;;  %v977_v50 = vmul.f32 %v2041_v49, %v2033_v30 }
 0x4e5   : > { %1817 = vmatmul.mubr.msk.bf16.vlgmr.msra.gmra.mxu1 %vm807_vm2, %v865_v47  ;;  %v978_v52 = vpack.c.bf16 %v977_v50, %v977_v50  ;;  %v2018_v50 = vld [vmem:[%s2740_s14 + $0x38] sm:$0xff]  }
 0x4e6   : > { %1827 = vmatpush3.bf16.msra.mxu1 %v985_v48  ;;  %1828 = vmatprep.mubr.msk.bf16.mxu1 %vm2278_vm1, %v2277_v15 }
 0x4e7   : > { %1838 = vmatprep.subr.bf16.mxu1 %v2277_v15 }
 0x4ea   : > { %v2043_v53 = vpop.eup %2042 }
 0x4eb   : > { %v1087_v55 = vmul.f32 %v2043_v53, %v2035_v32  ;;  %v2021_v53 = vld [vmem:[%s2740_s14 + $0x20] sm:$0xff]  }
 0x4ed   : > { %1829 = vmatmul.mubr.msk.bf16.vlgmr.msra.gmra.mxu1 %vm807_vm2, %v978_v52  ;;  %v1088_v56 = vpack.c.bf16 %v1087_v55, %v1087_v55  ;;  %v2020_v52 = vld [vmem:[%s2740_s14 + $0x28] sm:$0xff]   ;;  %v2023_v55 = vld [vmem:[%s2740_s14 + $0x10] sm:$0xff]  }
 0x4ee   : > { %1839 = vmatpush3.bf16.msra.mxu1 %v1095_v54  ;;  %1840 = vmatprep.mubr.msk.bf16.mxu1 %vm2278_vm1, %v2277_v15  ;;  %v2022_v54 = vld [vmem:[%s2740_s14 + $0x18] sm:$0xff]  }
 0x4ef   : > { %1850 = vmatprep.subr.bf16.mxu1 %v2277_v15 }
 0x4f5   : > { %1841 = vmatmul.mubr.msk.bf16.vlgmr.msra.gmra.mxu1 %vm807_vm2, %v1088_v56  ;;  %v2024_v56 = vld [vmem:[%s2740_s14 + $0x8] sm:$0xff]  }
 0x4f6   : > { %1852 = vmatprep.mubr.msk.bf16.mxu1 %vm2278_vm1, %v2277_v15 }
 0x50d   : > { %v1195_v57 = vpop.xlane.xlu1 %1194 }
 0x50e   : > { %2044 = vrcp.f32 %v1195_v57  ;;  %v2025_v57 = vld [vmem:[%s2740_s14] sm:$0xff]  }
 0x511   : > { %v1200_v58 = vpop.permute.xlu1 %1199 }
 0x512   : > { %v1205_v59 = vsel %vm872_vm3, %v1200_v58, 0  ;;  %v1738_v58 = vld [vmem:[%s2739_s13] ss:$0 sm:$0xff] }
 0x513   : > { %1851 = vmatpush3.bf16.msra.mxu1 %v1205_v59 }
 0x514   : > { %1864 = vmatprep.subr.bf16.mxu1 %v2277_v15 }
 0x51b   : > { %v2045_v60 = vpop.eup %2044 }
 0x51c   : > { %v1197_v61 = vmul.f32 %v2045_v60, %v2037_v37 }
 0x51e   : > { %v1198_v62 = vpack.c.bf16 %v1197_v61, %v1197_v61 }
 0x520   : > { %1853 = vmatmul.mubr.msk.bf16.vlgmr.msra.gmra.mxu1 %vm807_vm2, %v1198_v62 }
 0x521   : > { %1868 = vmatprep.mubr.msk.bf16.mxu1 %vm2278_vm1, %v2277_v15  ;;  %1865 = vmatpush3.bf16.msra.mxu1 %v2016_v39 }
 0x522   : > { %1866 = vmatprep.subr.bf16.mxu1 %v2277_v15 }
 0x5a5   : > { %v910_v63 = vpop.f32.mrf.mxu1 }
 0x5a7   : > { %v1818_v1 = vpop.f32.mrf.mxu1 }
 0x5a9   : > { %v913_v2 = vpop.f32.mrf.mxu1 }
 0x5ab   : > { %v1819_v4 = vpop.f32.mrf.mxu1 }
 0x5ad   : > { %v1021_v6 = vpop.f32.mrf.mxu1 }
 0x5ae   : > { %1248 = vrot.lane.b32.xlu0 %v1021_v6, %s2286_s3  ;;  %s2289_s3 = smov [#allocation11]  }
 0x5af   : > { %v1830_v7 = vpop.f32.mrf.mxu1 }
 0x5b0   : > { %v1742_v7 = vld [vmem:[%s2741_s15] ss:$0 sm:$0xff] }
 0x5b1   : > { %v1024_v8 = vpop.f32.mrf.mxu1 }
 0x5b3   : > { %v1831_v9 = vpop.f32.mrf.mxu1 }
 0x5b5   : > { %v1131_v10 = vpop.f32.mrf.mxu1 }
 0x5b6   : > { %1252 = vrot.lane.b32.xlu1 %v1131_v10, %s2287_s20  ;;  %s608_s20 = sand.u32 1, %s2254_s22  }
 0x5b7   : > { %v1842_v11 = vpop.f32.mrf.mxu1  ;;  %s1549_s24 = scalar_lea.sflag [#allocation4], %s608_s20 }
 0x5b9   : > { %v1134_v12 = vpop.f32.mrf.mxu1 }
 0x5bb   : > { %v1843_v13 = vpop.f32.mrf.mxu1 }
 0x5e0   : > { %v1241_v14 = vpop.f32.mrf.mxu1 }
 0x5e1   : > { %1256 = vrot.lane.b32.xlu0 %v1241_v14, %s2288_s30  ;;  %s1711_s30 = sshll.u32 %s608_s20, 3 }
 0x5e2   : > { %v1854_v16 = vpop.f32.mrf.mxu1  ;;  %s610_s23 = scalar_lea.vmem [#allocation11], %s1711_s30  ;;  %s2186_s30 = sshll.u32 %s2289_s3, 4  ;;  %s2187_s30 = int_to_ptr.vmem [resolvable:$false] %s2186_s30 }
 0x5e3   : > { %s1563_s17 = sshll.u32 %s610_s23, 4  ;;  %s2188_s27 = scalar_lea.vmem %s2187_s30, 256  ;;  %s2681_s17 = int_to_ptr.vmem [resolvable:$true] %s1563_s17 }
 0x5e4   : > { %v1244_v17 = vpop.f32.mrf.mxu1  ;;  %s2182_s19 = scalar_lea.vmem %s2681_s17, 128  ;;  %p2189_p5 = scmp.lt.s32.totalorder %s2681_s17, %s2187_s30 }
 0x5e5   : > { %p2183_p0 = scmp.ne.s32.totalorder %s2681_s17, %s2182_s19  ;;  %p2190_p4 = scmp.lt.s32.totalorder %s2188_s27, %s2182_s19 }
 0x5e6   : > { %v1855_v18 = vpop.f32.mrf.mxu1 }
 0x5e7   : > { %p2184_p8 = pnand %p2183_p0, %p2777_p2  ;;  %p2191_p10 = por %p2190_p4, %p2189_p5 }
 0x5e9   : > { %p2185_p3 = pneg %p2184_p8 }
 0x5eb   : > { %p2192_p11 = pnand %p2191_p10, %p2185_p3 }
 0x620   : > { %v1249_v19 = vpop.permute.xlu0 %1248 }
 0x621   : > { %v1259_v21 = vsel %vm807_vm2, %v910_v63, %v1249_v19 }
 0x628   : > { %v1253_v20 = vpop.permute.xlu1 %1252 }
 0x629   : > { %v1261_v22 = vsel %vm1260_vm4, %v1259_v21, %v1253_v20 }
 0x653   : > { %v1257_v23 = vpop.permute.xlu0 %1256 }
 0x654   : > { %v1263_v24 = vsel %vm1262_vm5, %v1261_v22, %v1257_v23 }
 0x655   : > { %v1264_v25 = vpack.c.bf16 %v1263_v24, %v1263_v24 }
 0x657   : > { %1861 = vmatmul.mubr.msk.bf16.vlgmr.msra.gmra.mxu0 %vm627_vm0, %v1264_v25 }
 0x658   : > { %1888 = vmatprep.mubr.msk.bf16.mxu0 %vm2278_vm1, %v2277_v15  ;;  %1873 = vmatpush3.bf16.msra.mxu0 %v2018_v50 }
 0x659   : > { %1874 = vmatprep.subr.bf16.mxu0 %v2277_v15 }
 0x65c   : > { %1875 = vmatpush3.bf16.msra.mxu0 %v2019_v51 }
 0x65d   : > { %1876 = vmatprep.subr.bf16.mxu0 %v2277_v15 }
 0x660   : > { %1877 = vmatpush3.bf16.msra.mxu0 %v2020_v52 }
 0x661   : > { %1878 = vmatprep.subr.bf16.mxu0 %v2277_v15 }
 0x664   : > { %1879 = vmatpush3.bf16.msra.mxu0 %v2021_v53 }
 0x665   : > { %1880 = vmatprep.subr.bf16.mxu0 %v2277_v15 }
 0x668   : > { %1881 = vmatpush3.bf16.msra.mxu0 %v2022_v54 }
 0x669   : > { %1882 = vmatprep.subr.bf16.mxu0 %v2277_v15 }
 0x66c   : > { %1883 = vmatpush3.bf16.msra.mxu0 %v2023_v55 }
 0x66d   : > { %1884 = vmatprep.subr.bf16.mxu0 %v2277_v15 }
 0x670   : > { %1885 = vmatpush3.bf16.msra.mxu0 %v2024_v56 }
 0x671   : > { %1886 = vmatprep.subr.bf16.mxu0 %v2277_v15 }
 0x674   : > { %1887 = vmatpush3.bf16.msra.mxu0 %v2025_v57 }
 0x717   : > { %v1325_v27 = vpop.f32.mrf.mxu0 }
 0x718   : > { %v1326_v28 = vadd.f32 %v1732_v26, %v1325_v27 }
 0x719   : > { %v1862_v29 = vpop.f32.mrf.mxu0 }
 0x71a   : > { %v2616_v30 = vadd.f32 %v1326_v28, %v2509_v0  ;;  %v2017_v0 = vld [vmem:[%s2738_s12] sm:$0xff]  }
 0x71b   : > { %v1328_v31 = vpop.f32.mrf.mxu0  ;;  %1867 = vmatpush3.bf16.msra.mxu1 %v2017_v0 }
 0x71c   : > { %v1334_v32 = vsel %vm627_vm0, %v2616_v30, 0.0 }
 0x71d   : > { %1335 = vadd.xlane.f32.xlu1 %v1334_v32  ;;  %v1863_v33 = vpop.f32.mrf.mxu0 }
 0x7a6   : > { %v1336_v34 = vpop.xlane.xlu1 %1335 }
 0x7a7   : > { %v1337_v35 = vmul.f32 0.03125, %v1336_v34 }
 0x7a9   : > { %v1338_v36 = vsub.f32 %v2616_v30, %v1337_v35 }
 0x7ab   : > { %v1339_v37 = vmul.f32 %v1338_v36, %v1338_v36 }
 0x7ad   : > { %v1340_v38 = vsel %vm627_vm0, %v1339_v37, 0.0 }
 0x7ae   : > { %1341 = vadd.xlane.f32.xlu0 %v1340_v38 }
 0x837   : > { %v1342_v40 = vpop.xlane.xlu0 %1341 }
 0x838   : > { %v1343_v41 = vmul.f32 0.03125, %v1342_v40 }
 0x83a   : > { %v1344_v42 = vadd.f32 1e-05, %v1343_v41 }
 0x83c   : > { %2046 = vrsqrt.f32 %v1344_v42 }
 0x849   : > { %v2047_v43 = vpop.eup %2046 }
 0x84a   : > { %v1346_v45 = vmul.f32 %v2047_v43, %v1338_v36 }
 0x84c   : > { %v1353_v47 = vmul.f32 %v1736_v44, %v1346_v45 }
 0x84e   : > { %v1360_v49 = vadd.f32 %v1737_v46, %v1353_v47 }
 0x850   : > { %v1361_v48 = vpack.c.bf16 %v1360_v49, %v1360_v49 }
 0x852   : > { %1869 = vmatmul.mubr.msk.bf16.vlgmr.msra.gmra.mxu1 %vm627_vm0, %v1361_v48 }
 0x912   : > { %v1422_v59 = vpop.f32.mrf.mxu1 }
 0x913   : > { %v1423_v60 = vadd.f32 %v1738_v58, %v1422_v59 }
 0x914   : > { %v1870_v61 = vpop.f32.mrf.mxu1 }
 0x915   : > { %v1428_v62 = vmul.f32 -1.702, %v1423_v60 }
 0x916   : > { %v1425_v63 = vpop.f32.mrf.mxu1 }
 0x917   : > { %v1429_v1 = vmul.f32 1.442695, %v1428_v62 }
 0x918   : > { %v1871_v2 = vpop.f32.mrf.mxu1 }
 0x919   : > { %2048 = vpow2.f32 %v1429_v1 }
 0x926   : > { %v2049_v15 = vpop.eup %2048 }
 0x927   : > { %v1431_v3 = vadd.f32 1.0, %v2049_v15 }
 0x929   : > { %2050 = vrcp.f32 %v1431_v3 }
 0x936   : > { %v2051_v4 = vpop.eup %2050 }
 0x937   : > { %v1433_v5 = vmul.f32 %v2051_v4, %v1423_v60 }
 0x939   : > { %v1434_v6 = vpack.c.bf16 %v1433_v5, %v1433_v5 }
 0x93b   : > { %1889 = vmatmul.mubr.bf16.vlgmr.msra.gmra.mxu0 %v1434_v6 }
 0x9fb   : > { %v1540_v8 = vpop.f32.mrf.mxu0 }
 0x9fc   : > { %v1541_v9 = vadd.f32 %v1742_v7, %v1540_v8 }
 0x9fd   : > { %v1890_v10 = vpop.f32.mrf.mxu0 }
 0x9fe   : > { %v1546_v11 = vadd.f32 %v1541_v9, %v2616_v30 }
 0x9ff   : > { %v1543_v12 = vpop.f32.mrf.mxu0 }
 0xa00   : > { %1547 = vst.msk [vmem:[%s610_s23] sm:$0xff] %vm627_vm0, %v1546_v11 }
 0xa01   : > { %v1891_v13 = vpop.f32.mrf.mxu0 }
 0xa02   : > { %2195 = shalt.err (!%p2192_p11)
}
 0xa03   : > { %s2196_s28 = scalar_lea.hbm %s2679_s25, 128  ;;  %s2200_s23 = scalar_lea.hbm %s2776_s18, 256 }
 0xa04   : > { %p2197_p6 = scmp.ne.s32.totalorder %s2679_s25, %s2196_s28  ;;  %p2201_p12 = scmp.lt.s32.totalorder %s2679_s25, %s2776_s18 }
 0xa05   : > { %p2202_p1 = scmp.lt.s32.totalorder %s2200_s23, %s2196_s28 }
 0xa06   : > { %p2198_p7 = pnand %p2197_p6, %p2777_p2 }
 0xa07   : > { %p2203_p13 = por %p2202_p1, %p2201_p12 }
 0xa08   : > { %p2199_p9 = pneg %p2198_p7 }
 0xa0a   : > { %p2204_p0 = pnand %p2203_p13, %p2199_p9 }
 0xa0c   : > { %2207 = shalt.err (!%p2204_p0)
}
 0xa0d   : > { %1912 = dma.vmem_to_hbm [thread:$0]  (%p2777_p2), %s2681_s17, 128, %s2679_s25, %s1549_s24  }
 0xa0e PF: > { %s2778_s26 = sld [smem:[#allocation19_spill]] }
 0xa0f   : > { %s2779_s19 = sld [smem:[#allocation16_spill]] }
 0xa10   : > { %s2780_s3 = sld [smem:[#allocation21_spill]] }
 0xa14   : > { %p1944_p8 = scmp.ge.s32.totalorder %s2778_s26, 2 }
 0xa15   : > { %s1575_s30 = sand.u32 1, %s2779_s19  }
 0xa16   : > { %p2781_p3 = scmp.ne.s32.totalorder %s2780_s3, 0  ;;  %s1576_s27 = scalar_lea.sflag [#allocation4], %s1575_s30 }
 0xa18   : > { %p1931_p5 = pnand %p1944_p8, %p2781_p3 }
 0xa1a   : > { %p1932_p4 = pneg %p1931_p5 }
 0xa1c   : > { %2245 = dma.done.wait (%p1932_p4), %s1576_s27, 128  }
 0xa1d   : > { %2247 = vsyncadd (%p1932_p4), %s1576_s27, 4294967168  ;;  %s32_s26 = sadd.s32 1, %s2778_s26   ;;  %s2782_s0 = sld [smem:[#allocation17_spill]] }
 0xa1e   : > { %p29_p10 = scmp.ge.s32.totalorder %s32_s26, 4   ;;  %s2783_s23 = sld [smem:[#allocation22_spill]] }
 0xa1f   : > { %s2784_s24 = sld [smem:[#allocation18_spill]]  ;;  %s2786_s21 = smov %s2254_s22 }
 0xa20   : > { %s2785_s25 = sld [smem:[#allocation20_spill]]  ;;  %31 = sbr.rel (!%p29_p10) target bundleno = 11 (0xb), region = 143 }
 0xa23   : > { %s2787_s22 = smov %s2782_s0 }
 0xa25   :  { %1581 = vsyncpa [#allocation3], 1 }
 0xa26   :  { %1583 = vsyncpa [#allocation3 + $0x1], 1 }
 0xa27   :  { %1584 = vsyncpa [#allocation6], 1 }
 0xa28   :  { %1585 = vsyncpa [#allocation9], 1 }
 0xa29   :  { %1586 = vsyncpa [#allocation4], 1 }
 0xa2a   :  { %1588 = vsyncpa [#allocation4 + $0x1], 1 }

</bundles_post_ra>
